<compile_context>
chip_gen: v7x
topology: tpu7x:2x2x1
jax: 0.10.0
libtpu: 0.0.40
codegen_flags: <defaults>
</compile_context>

<pallas_src>
import functools

import numpy as np
import jax
import jax.numpy as jnp
from jax.experimental import pallas as pl
from jax.experimental.pallas import tpu as pltpu

_SQRT_2_OVER_PI = float(np.sqrt(2.0 / np.pi))
# sigmoid form: 0.5*x*(1+tanh(z)) == x*sigmoid(2z), 2z = x*(C1 + C2*x^2)
_C1 = 2.0 * _SQRT_2_OVER_PI
_C2 = 2.0 * _SQRT_2_OVER_PI * 0.044715

_LANE_CANDIDATES = (2048, 1024, 512, 256, 128)


def _round_up(a: int, b: int) -> int:
    return (a + b - 1) // b * b


@functools.lru_cache(maxsize=1)
def _hw_params():
    """Per-TPU-generation knobs: (tile_bytes, vmem_limit_bytes, cores, bf16_math)."""
    tile_bytes = 4 * 1024 * 1024
    vmem_limit = 32 * 1024 * 1024
    cores = 1
    bf16_math = False
    try:
        kind = jax.devices()[0].device_kind.lower()
    except Exception:
        return tile_bytes, vmem_limit, cores, bf16_math
    if "v5" in kind:
        # v5e: no bf16 VPU/EUP -> f32 internal math. 4 MiB tiles already <6%
        # step overhead at ~0.8 TB/s; keep 32 MiB scoped VMEM (default 16 MiB
        # is too small for the 4x4 MiB double buffers).
        pass
    elif "v7" in kind or "tpu7" in kind:
        # v7x: 3.2 TB/s HBM, only 64 MiB physical VMEM, 2 TensorCores/chip.
        tile_bytes = 8 * 1024 * 1024       # 4 buffers * 8 MiB = 32 MiB in VMEM
        vmem_limit = 48 * 1024 * 1024
        cores = 2
        bf16_math = True
    else:
        # v6e (and default for unknown newer gens): bf16-native VPU/EUP.
        bf16_math = True
    return tile_bytes, vmem_limit, cores, bf16_math


def _make_gelu_kernel(compute_dtype):
    def kernel(x_ref, o_ref):
        x = x_ref[...].astype(compute_dtype)
        # GELU(x) = 0.5*x*(1+tanh(z)) = x*sigmoid(2z); 2z = x*(C1 + C2*x^2).
        # exp + divide ride the EUP slot; ~5 VPU ops/element.
        t = x * (_C1 + _C2 * (x * x))
        o_ref[...] = (x / (1.0 + jnp.exp(-t))).astype(o_ref.dtype)
    return kernel


def _gelu_pallas_flat(flat: jax.Array, lanes: int) -> jax.Array:
    """Streaming GELU over a 1-D array whose length is a multiple of `lanes`."""
    dtype = flat.dtype
    itemsize = jnp.dtype(dtype).itemsize
    tile_bytes, vmem_limit, cores, bf16_math = _hw_params()
    # Sublane packing unit: 8 rows for 32-bit, 16 for bf16, 32 for int8/fp8.
    sub_unit = max(8, 32 // itemsize)

    n = flat.shape[0]
    rows = n // lanes
    x2d = flat.reshape(rows, lanes)

    if rows <= sub_unit:
        # Tiny input: single block covering the whole array (full-dim block).
        tile_rows = rows
        grid = (1,)
    else:
        # ~tile_bytes per buffer; in+out double-buffered => 4x in VMEM.
        size_cap = max(
            sub_unit, (tile_bytes // (lanes * itemsize)) // sub_unit * sub_unit
        )
        # At least 2 grid blocks per TensorCore (>=4 on v7x) so megacore
        # sharding still leaves each core a pipelined multi-step loop.
        min_blocks = 2 * cores
        par_cap = max(sub_unit, (rows // min_blocks) // sub_unit * sub_unit)
        tile_rows = min(size_cap, par_cap)
        grid = (pl.cdiv(rows, tile_rows),)

    # bf16 inputs keep bf16 math on bf16-native gens (v6e/v7x); else f32.
    compute_dtype = (
        jnp.bfloat16 if (bf16_math and dtype == jnp.bfloat16) else jnp.float32
    )

    cost = pl.CostEstimate(
        flops=6 * n, transcendentals=n, bytes_accessed=2 * n * itemsize
    )

    out2d = pl.pallas_call(
        _make_gelu_kernel(compute_dtype),
        out_shape=jax.ShapeDtypeStruct((rows, lanes), dtype),
        grid_spec=pltpu.PrefetchScalarGridSpec(
            num_scalar_prefetch=0,
            grid=grid,
            in_specs=[pl.BlockSpec((tile_rows, lanes), lambda i: (i, 0))],
            out_specs=pl.BlockSpec((tile_rows, lanes), lambda i: (i, 0)),
        ),
        compiler_params=pltpu.CompilerParams(
            dimension_semantics=("parallel",),
            vmem_limit_bytes=vmem_limit,
        ),
        cost_estimate=cost,
    )(x2d)
    return out2d.reshape(-1)


def _gelu_jnp_ref(x: jax.Array) -> jax.Array:
    """Pure-JAX tanh-GELU (mirrors the PyTorch forward); used for <128-elem tails."""
    xf = x.astype(jnp.float32)
    y = 0.5 * xf * (1.0 + jnp.tanh(_SQRT_2_OVER_PI * (xf + 0.044715 * jnp.power(xf, 3))))
    return y.astype(x.dtype)


def gelu(x: jax.Array) -> jax.Array:
    """Tanh-approximate GELU matching the PyTorch reference module."""
    orig_shape = x.shape
    flat = x.reshape(-1)
    n = flat.shape[0]
    if n == 0:
        return x

    # Widest lane-dense column count that divides n exactly -> no pad/slice.
    for cand in _LANE_CANDIDATES:
        if n % cand == 0:
            return _gelu_pallas_flat(flat, cand).reshape(orig_shape)

    # n not a multiple of 128: Pallas kernel on the largest 128-multiple prefix,
    # plain jnp on the (<128-element) tail. Avoids the pad + slice full copies.
    prefix_n = (n // 128) * 128
    tail_out = _gelu_jnp_ref(flat[prefix_n:])
    if prefix_n == 0:
        return tail_out.reshape(orig_shape)
    lanes = 128
    for cand in _LANE_CANDIDATES[:-1]:
        if prefix_n % cand == 0:
            lanes = cand
            break
    head_out = _gelu_pallas_flat(flat[:prefix_n], lanes)
    return jnp.concatenate([head_out, tail_out]).reshape(orig_shape)


def _gelu_reference(x):
    # Pure-JAX reference mirroring the PyTorch forward exactly (tanh approx).
    xf = x.astype(jnp.float32)
    y = 0.5 * xf * (1.0 + jnp.tanh(_SQRT_2_OVER_PI * (xf + 0.044715 * jnp.power(xf, 3))))
    return y.astype(x.dtype)


if __name__ == "__main__":
    key = jax.random.PRNGKey(0)
    k1, k2, k3 = jax.random.split(key, 3)

    # Primary NCHW test shape consistent with the module's typical usage.
    x = jax.random.normal(key, (2, 4, 16, 16), dtype=jnp.float32)
    y = gelu(x)
    jax.block_until_ready(y)
    np.testing.assert_allclose(np.asarray(y), np.asarray(_gelu_reference(x)),
                               rtol=1e-5, atol=1e-5)

    # Multi-block + ragged-last-block path (rows not a multiple of tile_rows).
    x2 = jax.random.normal(k1, (5, 8, 16, 128), dtype=jnp.float32)
    y2 = gelu(x2)
    jax.block_until_ready(y2)
    np.testing.assert_allclose(np.asarray(y2), np.asarray(_gelu_reference(x2)),
                               rtol=1e-5, atol=1e-5)

    # bf16 path (bf16 internal math on v6e/v7x, f32 on v5e).
    x3 = jax.random.normal(k2, (2, 3, 32, 128), dtype=jnp.bfloat16)
    y3 = gelu(x3)
    jax.block_until_ready(y3)
    np.testing.assert_allclose(np.asarray(y3).astype(np.float32),
                               np.asarray(_gelu_reference(x3)).astype(np.float32),
                               rtol=2e-2, atol=2e-2)

    # Non-multiple-of-128 element count -> prefix kernel + jnp tail split.
    x4 = jax.random.normal(k3, (7, 293), dtype=jnp.float32)  # 2051 elements
    y4 = gelu(x4)
    jax.block_until_ready(y4)
    np.testing.assert_allclose(np.asarray(y4), np.asarray(_gelu_reference(x4)),
                               rtol=1e-5, atol=1e-5)

    print("KERNEL_OK")
</pallas_src>

<mosaic_0001>
module attributes {stable_mosaic.version = 11 : i64} {
  func.func @kernel(%arg0: i32, %arg1: memref<1x2048xf32, #tpu.memory_space<vmem>>, %arg2: memref<1x2048xf32, #tpu.memory_space<vmem>>) attributes {dimension_semantics = [#tpu.dimension_semantics<parallel>], iteration_bounds = array<i64: 1>, scalar_prefetch = 0 : i64, scratch_operands = 0 : i64, tpu.core_type = #tpu.core_type<tc>, window_params = [{transform_indices = @transform_0, window_bounds = array<i64: 1, 2048>}, {transform_indices = @transform_1, window_bounds = array<i64: 1, 2048>}]} {
    %c0 = arith.constant 0 : index
    %c0_0 = arith.constant 0 : index
    %0 = vector.load %arg1[%c0, %c0_0] : memref<1x2048xf32, #tpu.memory_space<vmem>>, vector<1x2048xf32>
    %1 = arith.mulf %0, %0 : vector<1x2048xf32>
    %cst = arith.constant 0.0713548139 : f32
    %2 = vector.broadcast %cst : f32 to vector<1x2048xf32>
    %3 = arith.mulf %2, %1 : vector<1x2048xf32>
    %cst_1 = arith.constant 1.59576917 : f32
    %4 = vector.broadcast %cst_1 : f32 to vector<1x2048xf32>
    %5 = arith.addf %4, %3 : vector<1x2048xf32>
    %6 = arith.mulf %0, %5 : vector<1x2048xf32>
    %cst_2 = arith.constant 0.000000e+00 : f32
    %7 = vector.broadcast %cst_2 : f32 to vector<1x2048xf32>
    %8 = arith.subf %7, %6 : vector<1x2048xf32>
    %9 = math.exp %8 : vector<1x2048xf32>
    %cst_3 = arith.constant 1.000000e+00 : f32
    %10 = vector.broadcast %cst_3 : f32 to vector<1x2048xf32>
    %11 = arith.addf %10, %9 : vector<1x2048xf32>
    %12 = arith.divf %0, %11 : vector<1x2048xf32>
    %c0_4 = arith.constant 0 : index
    %c0_5 = arith.constant 0 : index
    %13 = vector.load %arg2[%c0_4, %c0_5] : memref<1x2048xf32, #tpu.memory_space<vmem>>, vector<1x2048xf32>
    tpu.vector_store %arg2[%c0_4, %c0_5], %12 {strides = array<i32>} : memref<1x2048xf32, #tpu.memory_space<vmem>>, vector<1x2048xf32>,
    return
  }
  func.func @transform_0(%arg0: i32) -> (i32, i32) {
    %c0_i32 = arith.constant 0 : i32
    %c0_i32_0 = arith.constant 0 : i32
    return %arg0, %c0_i32 : i32, i32
  }
  func.func @transform_1(%arg0: i32) -> (i32, i32) {
    %c0_i32 = arith.constant 0 : i32
    %c0_i32_0 = arith.constant 0 : i32
    return %arg0, %c0_i32 : i32, i32
  }
}

</mosaic_0001>

<bundles_post_ra>
// kernel: tpu_custom_call.1
= control target key start
LH: loop header
LB: loop body
LE: loop exit
PB: predicated region body
PF: predicated region fallthrough
CT: control target
= control target key end

     0   :  { %6 = vsyncpa [#allocation3], 0  ;;  %s154_s0 = inlined_call_operand.hbm [shape: f32[1,2048], index: 0, kind: input, shape index: {}]   ;;  %s155_s1 = inlined_call_operand.hbm [shape: f32[1,2048], index: 1, kind: output, shape index: {}]  }
   0x1   :  { %7 = vsyncpa [#allocation4], 0  ;;  %s118_s6 = smov [#allocation2]   ;;  %s70_s10 = scalar_lea.hbm %s154_s0, 256 }
   0x2   :  { %s14_s7 = sshll.u32 %s118_s6, 4  ;;  %p71_p0 = scmp.ne.s32.totalorder %s154_s0, %s70_s10  ;;  %s15_s7 = int_to_ptr.vmem [resolvable:$true] %s14_s7 }
   0x3   :  { %p74_p1 = scmp.lt.u32.totalorder %s70_s10, %s154_s0 }
   0x5   :  { %p76_p2 = pnand %p74_p1, %p71_p0 }
   0x7   :  { %79 = shalt.err (!%p76_p2)
}
   0x8   :  { %s80_s15 = scalar_lea.vmem %s15_s7, 256  ;;  %p85_p4 = scmp.lt.s32.totalorder %s15_s7, %s15_s7 }
   0x9   :  { %p81_p3 = scmp.ne.s32.totalorder %s15_s7, %s80_s15  ;;  %p86_p5 = scmp.lt.s32.totalorder %s80_s15, %s80_s15 }
   0xb   :  { %p87_p6 = por %p86_p5, %p85_p4 }
   0xd   :  { %p88_p7 = pnand %p87_p6, %p81_p3 }
   0xf   :  { %91 = shalt.err (!%p88_p7)
}
  0x10   :  { %17 = dma.hbm_to_vmem [thread:$0]  %s154_s0, 256, %s15_s7, [#allocation3]  }
  0x11   :  { %114 = dma.done.wait [#allocation3], 256  }
  0x12   :  { %115 = vsyncadd [#allocation3], 4294967040  ;;  %v21_v0 = vld [vmem:[#allocation2] sm:$0xff]  ;;  %v22_v1 = vld [vmem:[#allocation2 + $0x8] sm:$0xff]  ;;  %s119_s0 = smov [#allocation5]  }
  0x13   :  { %v23_v2 = vmul.f32 %v21_v0, %v21_v0  ;;  %v24_v3 = vmul.f32 %v22_v1, %v22_v1  ;;  %s51_s18 = sshll.u32 %s119_s0, 4  ;;  %s52_s18 = int_to_ptr.vmem [resolvable:$true] %s51_s18 }
  0x14   :  { %s92_s19 = scalar_lea.vmem %s52_s18, 256  ;;  %p97_p9 = scmp.lt.s32.totalorder %s52_s18, %s52_s18 }
  0x15   :  { %v25_v4 = vmul.f32 0.071354814, %v23_v2  ;;  %v26_v5 = vmul.f32 0.071354814, %v24_v3  ;;  %p93_p8 = scmp.ne.s32.totalorder %s52_s18, %s92_s19  ;;  %p98_p10 = scmp.lt.s32.totalorder %s92_s19, %s92_s19 }
  0x17   :  { %v27_v6 = vadd.f32 1.5957692, %v25_v4  ;;  %v28_v7 = vadd.f32 1.5957692, %v26_v5  ;;  %p99_p11 = por %p98_p10, %p97_p9 }
  0x19   :  { %v29_v8 = vmul.f32 %v27_v6, %v21_v0  ;;  %v30_v9 = vmul.f32 %v28_v7, %v22_v1  ;;  %p100_p12 = pnand %p99_p11, %p93_p8 }
  0x1b   :  { %v31_v10 = vsub.f32 0.0, %v29_v8  ;;  %v32_v11 = vsub.f32 0.0, %v30_v9 }
  0x1d   :  { %v33_v12 = vmul.f32 1.442695, %v31_v10  ;;  %v35_v13 = vmul.f32 1.442695, %v32_v11 }
  0x1f   :  { %62 = vpow2.f32 %v33_v12 }
  0x20   :  { %64 = vpow2.f32 %v35_v13 }
  0x29   :  { %v63_v14 = vpop.eup %62 }
  0x2a   :  { %v65_v15 = vpop.eup %64  ;;  %v37_v16 = vadd.f32 1.0, %v63_v14 }
  0x2b   :  { %v38_v17 = vadd.f32 1.0, %v65_v15 }
  0x2c   :  { %66 = vrcp.f32 %v37_v16 }
  0x2d   :  { %68 = vrcp.f32 %v38_v17 }
  0x36   :  { %v67_v18 = vpop.eup %66 }
  0x37   :  { %v69_v19 = vpop.eup %68  ;;  %v40_v20 = vmul.f32 %v67_v18, %v21_v0 }
  0x38   :  { %v42_v21 = vmul.f32 %v69_v19, %v22_v1 }
  0x39   :  { %43 = vst [vmem:[#allocation5] sm:$0xff] %v40_v20 }
  0x3a   :  { %44 = vst [vmem:[#allocation5 + $0x8] sm:$0xff] %v42_v21 }
  0x3b   :  { %103 = shalt.err (!%p100_p12)
}
  0x3c   :  { %s104_s22 = scalar_lea.hbm %s155_s1, 256 }
  0x3d   :  { %p105_p13 = scmp.ne.s32.totalorder %s155_s1, %s104_s22  ;;  %p108_p0 = scmp.lt.u32.totalorder %s104_s22, %s155_s1 }
  0x3f   :  { %p110_p1 = pnand %p108_p0, %p105_p13 }
  0x41   :  { %113 = shalt.err (!%p110_p1)
}
  0x42   :  { %54 = dma.vmem_to_hbm [thread:$0]  %s52_s18, 256, %s155_s1, [#allocation4]  }
  0x43   :  { %116 = dma.done.wait [#allocation4], 256  }
  0x44   :  { %117 = vsyncadd [#allocation4], 4294967040 }
  0x45   :  { %58 = vsyncpa [#allocation3], 1 }
  0x46   :  { %59 = vsyncpa [#allocation4], 1 }

</bundles_post_ra>
